<compile_context>
chip_gen: v5e
topology: v5e:2x2
jax: 0.10.0
libtpu: 0.0.40
codegen_flags: <defaults>
</compile_context>

<pallas_src>
import jax
import jax.numpy as jnp
from jax.experimental import pallas as pl
from jax.experimental.pallas import tpu as pltpu


def spatial_attention_kernel(x_ref, w1_ref, b1_ref, w2_ref, b2_ref, o_ref):
    x = x_ref[...]                                   # (C, T) f32, HW on lanes
    xb = x.astype(jnp.bfloat16)                      # bf16 operands for the MXU
    h = jnp.dot(w1_ref[...], xb, preferred_element_type=jnp.float32)       # (C//8, T)
    h = jnp.maximum(h + b1_ref[...], 0.0)                                  # ReLU (f32)
    a = jnp.dot(w2_ref[...], h.astype(jnp.bfloat16),
                preferred_element_type=jnp.float32)                        # (C, T)
    a = jax.nn.sigmoid(a + b2_ref[...])                                    # EUP, f32
    o_ref[...] = (x * a).astype(o_ref.dtype)                               # gate in f32


def _chip_tuning():
    """Return (max_block_bytes, vmem_limit_bytes) per TPU generation.

    Conservative fallback for unknown / v5e (16 MiB scoped-VMEM default)."""
    try:
        kind = jax.devices()[0].device_kind.lower()
    except Exception:
        kind = ""
    if "v7" in kind or "7x" in kind:
        # 64 MiB physical VMEM; bigger blocks to amortize per-step cost at 3.2 TB/s,
        # raise the scoped limit above the 32 MiB default but stay under physical.
        return 6 << 20, 48 << 20
    if "v6" in kind:
        return 4 << 20, 64 << 20
    # v5e and anything unrecognised: small blocks, explicit (modest) vmem limit.
    return 2 << 20, 32 << 20


def _pick_tile_hw(hw, c, itemsize, max_block_bytes):
    """Largest lane-dense (multiple-of-128) HW tile under the per-block byte cap."""
    lane = 128
    hw_cover = pl.cdiv(hw, lane) * lane
    cap = max(lane, (max_block_bytes // (c * itemsize)) // lane * lane)
    return int(min(hw_cover, cap))


def spatial_attention(x_nchw, w1, b1, w2, b2, *, tile_hw=None):
    """x_nchw: (N, C, H, W) float32.
    w1: (C//8, C)  = conv1.weight squeezed,  b1: (C//8,)
    w2: (C, C//8)  = conv2.weight squeezed,  b2: (C,)
    Returns (N, C, H, W), same dtype as x."""
    N, C, H, W = x_nchw.shape
    Ch = w1.shape[0]
    HW = H * W

    max_block_bytes, vmem_limit = _chip_tuning()
    if tile_hw is None:
        tile_hw = _pick_tile_hw(HW, C, x_nchw.dtype.itemsize, max_block_bytes)
        # Keep enough grid steps to occupy both v7x TensorCores and give the
        # pipeline a next block to prefetch (harmless on single-TC chips: only
        # kicks in when total work is tiny).
        min_steps = 8
        while tile_hw > 128 and N * pl.cdiv(HW, tile_hw) < min_steps:
            tile_hw = max(128, (tile_hw // 2) // 128 * 128)
    num_hw_tiles = pl.cdiv(HW, tile_hw)

    # NCHW-native: collapse H,W onto the lane axis (a free reshape, no transpose,
    # no padding — Pallas masks the partial final HW block).
    x3 = x_nchw.reshape(N, C, HW)

    w1b = w1.astype(jnp.bfloat16)                 # MXU operands in bf16
    w2b = w2.astype(jnp.bfloat16)
    b1c = b1.reshape(Ch, 1).astype(jnp.float32)   # biases broadcast along lanes, f32
    b2c = b2.reshape(C, 1).astype(jnp.float32)

    out3 = pl.pallas_call(
        spatial_attention_kernel,
        out_shape=jax.ShapeDtypeStruct((N, C, HW), x3.dtype),
        grid=(N, num_hw_tiles),
        in_specs=[
            pl.BlockSpec((None, C, tile_hw), lambda n, j: (n, 0, j)),  # x tile (batch squeezed)
            pl.BlockSpec((Ch, C), lambda n, j: (0, 0)),                # conv1 weight (bf16)
            pl.BlockSpec((Ch, 1), lambda n, j: (0, 0)),                # conv1 bias column (f32)
            pl.BlockSpec((C, Ch), lambda n, j: (0, 0)),                # conv2 weight (bf16)
            pl.BlockSpec((C, 1), lambda n, j: (0, 0)),                 # conv2 bias column (f32)
        ],
        out_specs=pl.BlockSpec((None, C, tile_hw), lambda n, j: (n, 0, j)),
        compiler_params=pltpu.CompilerParams(
            dimension_semantics=("parallel", "parallel"),
            vmem_limit_bytes=vmem_limit),
    )(x3, w1b, b1c, w2b, b2c)

    return out3.reshape(N, C, H, W)


def reference(x, w1, b1, w2, b2):
    h = jnp.einsum('oc,nchw->nohw', w1, x) + b1[None, :, None, None]
    h = jnp.maximum(h, 0.0)
    a = jnp.einsum('co,nohw->nchw', w2, h) + b2[None, :, None, None]
    a = jax.nn.sigmoid(a)
    return x * a


if __name__ == "__main__":
    # Small shapes consistent with the module: in_channels=16 -> hidden=16//8=2.
    N, C, H, W = 2, 16, 16, 16
    Ch = C // 8

    key = jax.random.PRNGKey(0)
    kx, k1, kb1, k2, kb2 = jax.random.split(key, 5)

    x = jax.random.normal(kx, (N, C, H, W), dtype=jnp.float32)

    # PyTorch conv1.weight has shape (C//8, C, 1, 1); squeezed matmul form is (C//8, C).
    w1 = jax.random.normal(k1, (Ch, C), dtype=jnp.float32) * 0.1
    b1 = jax.random.normal(kb1, (Ch,), dtype=jnp.float32) * 0.1
    # PyTorch conv2.weight has shape (C, C//8, 1, 1); squeezed matmul form is (C, C//8).
    w2 = jax.random.normal(k2, (C, Ch), dtype=jnp.float32) * 0.1
    b2 = jax.random.normal(kb2, (C,), dtype=jnp.float32) * 0.1

    # bf16 MXU operands: compare against f32 reference with a relaxed tolerance.
    out = spatial_attention(x, w1, b1, w2, b2)
    out = jax.block_until_ready(out)
    ref = reference(x, w1, b1, w2, b2)
    assert out.shape == (N, C, H, W)
    assert jnp.allclose(out, ref, atol=2e-2, rtol=2e-2), float(jnp.max(jnp.abs(out - ref)))

    # Exercise the partial-final-block path (H*W = 100, not a multiple of 128) —
    # handled by Pallas masked stores, no wrapper pad/slice.
    x_odd = jax.random.normal(kx, (N, C, 10, 10), dtype=jnp.float32)
    out_odd = jax.block_until_ready(spatial_attention(x_odd, w1, b1, w2, b2))
    ref_odd = reference(x_odd, w1, b1, w2, b2)
    assert out_odd.shape == (N, C, 10, 10)
    assert jnp.allclose(out_odd, ref_odd, atol=2e-2, rtol=2e-2)

    # TODO(synk): if the downstream consumer accepts bf16 activations, emit bf16
    # output (halves store bytes on this bandwidth-bound op); kept f32 to preserve
    # the module's dtype contract.
    print("KERNEL_OK")
</pallas_src>

<mosaic_0001>
module attributes {stable_mosaic.version = 11 : i64} {
  func.func @spatial_attention_kernel(%arg0: i32, %arg1: i32, %arg2: memref<1x16x128xf32, #tpu.memory_space<vmem>>, %arg3: memref<2x16xbf16, #tpu.memory_space<vmem>>, %arg4: memref<2x1xf32, #tpu.memory_space<vmem>>, %arg5: memref<16x2xbf16, #tpu.memory_space<vmem>>, %arg6: memref<16x1xf32, #tpu.memory_space<vmem>>, %arg7: memref<1x16x128xf32, #tpu.memory_space<vmem>>) attributes {dimension_semantics = [#tpu.dimension_semantics<parallel>, #tpu.dimension_semantics<parallel>], iteration_bounds = array<i64: 2, 2>, scalar_prefetch = 0 : i64, scratch_operands = 0 : i64, tpu.core_type = #tpu.core_type<tc>, window_params = [{transform_indices = @transform_0, window_bounds = array<i64: 1, 16, 128>}, {pipeline_mode = #tpu.pipeline_mode<synchronous>, transform_indices = @transform_1, window_bounds = array<i64: 2, 16>}, {pipeline_mode = #tpu.pipeline_mode<synchronous>, transform_indices = @transform_2, window_bounds = array<i64: 2, 1>}, {pipeline_mode = #tpu.pipeline_mode<synchronous>, transform_indices = @transform_3, window_bounds = array<i64: 16, 2>}, {pipeline_mode = #tpu.pipeline_mode<synchronous>, transform_indices = @transform_4, window_bounds = array<i64: 16, 1>}, {transform_indices = @transform_5, window_bounds = array<i64: 1, 16, 128>}]} {
    %c0 = arith.constant 0 : index
    %c0_0 = arith.constant 0 : index
    %c0_1 = arith.constant 0 : index
    %0 = vector.load %arg2[%c0, %c0_0, %c0_1] : memref<1x16x128xf32, #tpu.memory_space<vmem>>, vector<1x16x128xf32>
    %1 = vector.shape_cast %0 : vector<1x16x128xf32> to vector<16x128xf32>
    %2 = arith.truncf %1 : vector<16x128xf32> to vector<16x128xbf16>
    %c0_2 = arith.constant 0 : index
    %c0_3 = arith.constant 0 : index
    %3 = vector.load %arg3[%c0_2, %c0_3] : memref<2x16xbf16, #tpu.memory_space<vmem>>, vector<2x16xbf16>
    %cst = arith.constant dense<0.000000e+00> : vector<2x128xf32>
    %4 = tpu.matmul %3, %2, %cst {dimension_numbers = #tpu.dot_dimension_numbers<[1], [0], [0], [1], [0, 0, 1, 1], [], []>} : vector<2x16xbf16>, vector<16x128xbf16>, vector<2x128xf32> -> vector<2x128xf32>
    %c0_4 = arith.constant 0 : index
    %c0_5 = arith.constant 0 : index
    %5 = vector.load %arg4[%c0_4, %c0_5] : memref<2x1xf32, #tpu.memory_space<vmem>>, vector<2x1xf32>
    %6 = vector.broadcast %5 : vector<2x1xf32> to vector<2x128xf32>
    %7 = arith.addf %4, %6 : vector<2x128xf32>
    %cst_6 = arith.constant 0.000000e+00 : f32
    %8 = vector.broadcast %cst_6 : f32 to vector<2x128xf32>
    %9 = arith.maximumf %7, %8 : vector<2x128xf32>
    %c0_7 = arith.constant 0 : index
    %c0_8 = arith.constant 0 : index
    %10 = vector.load %arg5[%c0_7, %c0_8] : memref<16x2xbf16, #tpu.memory_space<vmem>>, vector<16x2xbf16>
    %11 = arith.truncf %9 : vector<2x128xf32> to vector<2x128xbf16>
    %cst_9 = arith.constant dense<0.000000e+00> : vector<16x128xf32>
    %12 = tpu.matmul %10, %11, %cst_9 {dimension_numbers = #tpu.dot_dimension_numbers<[1], [0], [0], [1], [0, 0, 1, 1], [], []>} : vector<16x2xbf16>, vector<2x128xbf16>, vector<16x128xf32> -> vector<16x128xf32>
    %c0_10 = arith.constant 0 : index
    %c0_11 = arith.constant 0 : index
    %13 = vector.load %arg6[%c0_10, %c0_11] : memref<16x1xf32, #tpu.memory_space<vmem>>, vector<16x1xf32>
    %14 = vector.broadcast %13 : vector<16x1xf32> to vector<16x128xf32>
    %15 = arith.addf %12, %14 : vector<16x128xf32>
    %16 = arith.negf %15 : vector<16x128xf32>
    %17 = math.exp %16 : vector<16x128xf32>
    %cst_12 = arith.constant 1.000000e+00 : f32
    %18 = vector.broadcast %cst_12 : f32 to vector<16x128xf32>
    %19 = arith.addf %18, %17 : vector<16x128xf32>
    %20 = arith.divf %18, %19 : vector<16x128xf32>
    %21 = arith.mulf %1, %20 : vector<16x128xf32>
    %c0_13 = arith.constant 0 : index
    %c0_14 = arith.constant 0 : index
    %c0_15 = arith.constant 0 : index
    %22 = vector.load %arg7[%c0_13, %c0_14, %c0_15] : memref<1x16x128xf32, #tpu.memory_space<vmem>>, vector<1x16x128xf32>
    %23 = vector.shape_cast %22 : vector<1x16x128xf32> to vector<16x128xf32>
    %24 = vector.shape_cast %21 : vector<16x128xf32> to vector<1x16x128xf32>
    tpu.vector_store %arg7[%c0_13, %c0_14, %c0_15], %24 {strides = array<i32>} : memref<1x16x128xf32, #tpu.memory_space<vmem>>, vector<1x16x128xf32>,
    return
  }
  func.func @transform_0(%arg0: i32, %arg1: i32) -> (i32, i32, i32) {
    %c0_i32 = arith.constant 0 : i32
    %c0_i32_0 = arith.constant 0 : i32
    return %arg0, %c0_i32, %arg1 : i32, i32, i32
  }
  func.func @transform_1(%arg0: i32, %arg1: i32) -> (i32, i32) {
    %c0_i32 = arith.constant 0 : i32
    %c0_i32_0 = arith.constant 0 : i32
    %c0_i32_1 = arith.constant 0 : i32
    return %c0_i32, %c0_i32_0 : i32, i32
  }
  func.func @transform_2(%arg0: i32, %arg1: i32) -> (i32, i32) {
    %c0_i32 = arith.constant 0 : i32
    %c0_i32_0 = arith.constant 0 : i32
    %c0_i32_1 = arith.constant 0 : i32
    return %c0_i32, %c0_i32_0 : i32, i32
  }
  func.func @transform_3(%arg0: i32, %arg1: i32) -> (i32, i32) {
    %c0_i32 = arith.constant 0 : i32
    %c0_i32_0 = arith.constant 0 : i32
    %c0_i32_1 = arith.constant 0 : i32
    return %c0_i32, %c0_i32_0 : i32, i32
  }
  func.func @transform_4(%arg0: i32, %arg1: i32) -> (i32, i32) {
    %c0_i32 = arith.constant 0 : i32
    %c0_i32_0 = arith.constant 0 : i32
    %c0_i32_1 = arith.constant 0 : i32
    return %c0_i32, %c0_i32_0 : i32, i32
  }
  func.func @transform_5(%arg0: i32, %arg1: i32) -> (i32, i32, i32) {
    %c0_i32 = arith.constant 0 : i32
    %c0_i32_0 = arith.constant 0 : i32
    return %arg0, %c0_i32, %arg1 : i32, i32, i32
  }
}

</mosaic_0001>

<bundles_post_ra>
// kernel: tpu_custom_call.1
= control target key start
LH: loop header
LB: loop body
LE: loop exit
PB: predicated region body
PF: predicated region fallthrough
CT: control target
= control target key end

     0   :  { %10 = vsyncpa [#allocation3], 0  ;;  %s931_s0 = inlined_call_operand.hbm [shape: f32[2,16,256], index: 0, kind: input, shape index: {}]   ;;  %s932_s1 = inlined_call_operand.vmem [shape: bf16[2,16], index: 1, kind: input, shape index: {}]   ;;  %s933_s2 = inlined_call_operand.vmem [shape: f32[2,1], index: 2, kind: input, shape index: {}]   ;;  %s934_s3 = inlined_call_operand.vmem [shape: bf16[16,2], index: 3, kind: input, shape index: {}]   ;;  %s935_s4 = inlined_call_operand.vmem [shape: f32[16,1], index: 4, kind: input, shape index: {}]   ;;  %s936_s5 = inlined_call_operand.hbm [shape: f32[2,16,256], index: 5, kind: output, shape index: {}]  }
   0x1   :  { %12 = vsyncpa [#allocation3 + $0x1], 0 }
   0x2   :  { %13 = vsyncpa [#allocation4], 0 }
   0x3   :  { %15 = vsyncpa [#allocation4 + $0x1], 0  ;;  %s766_s18 = smov 0   ;;  %s768_s19 = smov 0  }
   0x4   :  { %s770_s20 = smov 0   ;;  %s772_s21 = smov 0  }
   0x5   :  { %s774_s22 = smov 0   ;;  %s776_s23 = smov 0  }
   0x6   :  { %s778_s24 = smov 0   ;;  %s780_s25 = smov 0  }
   0x7 LB: > { %941 = sst [smem:[#allocation8_spill]] %s707_s20  ;;  %s480_s26 = sadd.s32 4294967295, %s727_s25   ;;  %s727_s25 = sphi %s780_s25, %s21_s25   ;;  %s723_s24 = sphi %s778_s24, %s960_s24   ;;  %s719_s23 = sphi %s776_s23, %s959_s23   ;;  %s715_s22 = sphi %s774_s22, %s958_s22   ;;  %s711_s21 = sphi %s772_s21, %s957_s21   ;;  %s707_s20 = sphi %s770_s20, %s952_s20   ;;  %s703_s19 = sphi %s768_s19, %s956_s19   ;;  %s699_s18 = sphi %s766_s18, %s955_s18  }
   0x8   : > { %s481_s27 = sadd.s32 4294967294, %s727_s25   ;;  %s30_s28 = sadd.s32 1, %s719_s23 }
   0x9   : > { %s33_s29 = sadd.s32 1, %s723_s24  ;;  %p31_p0 = scmp.ge.s32.totalorder %s30_s28, 2 }
   0xa   : > { %s42_s30 = sadd.s32 1, %s707_s20  ;;  %p49_p1 = scmp.ne.s32.totalorder %s707_s20, %s703_s19 }
   0xb   : > { %p50_p2 = scmp.eq.s32.totalorder %s727_s25, 0  ;;  %s962_s28 = smov (%p31_p0, %s30_s28), 0 }
   0xc   : > { %942 = sst [smem:[#allocation9_spill]] %s962_s28  ;;  %s964_s29 = smov (!%p31_p0, %s33_s29), %s723_s24 }
   0xd   : > { %s38_s6 = ssub.s32 %s719_s23, %s962_s28  ;;  %p819_p3 = por %p50_p2, %p49_p1 }
   0xe   : > { %p35_p4 = scmp.ge.s32.totalorder %s964_s29, 2  ;;  %p55_p5 = scmp.ne.s32.totalorder %s703_s19, %s699_s18 }
   0xf   : > { %p56_p6 = scmp.eq.s32.totalorder %s480_s26, 0  ;;  %p165_p7 = scmp.eq.s32.totalorder %s480_s26, 3 }
  0x10   : > { %s966_s29 = smov (%p35_p4, %s964_s29), 0  ;;  %p171_p10 = scmp.eq.s32.totalorder %s481_s27, 3 }
  0x11   : > { %944 = sst [smem:[#allocation10_spill]] %s966_s29  ;;  %p827_p8 = por %p56_p6, %p55_p5 }
  0x12   : > { %p831_p9 = por %p165_p7, %p49_p1  ;;  %s37_s10 = ssub.s32 %s723_s24, %s966_s29 }
  0x13   : > { %s39_s11 = sor.u32 %s38_s6, %s37_s10  ;;  %p837_p12 = por %p171_p10, %p55_p5 }
  0x14   : > { %p40_p11 = scmp.eq.s32.totalorder %s39_s11, 0  ;;  %p516_p13 = scmp.lt.s32.totalorder %s727_s25, 4 }
  0x15   : > { %s947_s12 = scalar_select %p837_p12, 1, 0 }
  0x16   : > { %s203_s13 = sand.u32 1, %s707_s20   ;;  %s485_s16 = sshll.u32 %s723_s24, 2 }
  0x17   : > { %948 = sst [smem:[#allocation11_spill]] %s947_s12  ;;  %s484_s15 = sshll.u32 %s203_s13, 4 }
  0x18   : > { %s844_s14 = scalar_select %p40_p11, %s707_s20, %s42_s30  }
  0x19   : > { %s211_s17 = sadd.s32 %s719_s23, %s485_s16  ;;  %s207_s26 = scalar_lea.vmem [#allocation2], %s484_s15 }
  0x1a   : > { %949 = sst [smem:[#allocation12_spill]] %s844_s14  ;;  %s216_s28 = sshll.u32 %s207_s26, 4  ;;  %s217_s28 = int_to_ptr.vmem [resolvable:$true] %s216_s28 }
  0x1b   : > { %s486_s29 = sshll.u32 %s211_s17, 3  ;;  %p509_p0 = pnand %p516_p13, %p819_p3 }
  0x1c   : > { %s213_s10 = scalar_lea.hbm %s931_s0, %s486_s29  ;;  %s204_s12 = scalar_lea.sflag [#allocation3], %s203_s13 }
  0x1d   : > { %s214_s11 = sshll.u32 %s213_s10, 4  ;;  %s729_s30 = smov 256   ;;  %s215_s11 = int_to_ptr.hbm [resolvable:$true] %s214_s11 }
  0x1e   : > { %s730_s14 = smov 128   ;;  %s731_s20 = smov 8  }
  0x1f   : > { %511 = dma.hbm_to_vmem [thread:$0]  (!%p509_p0), %s215_s11, 256, %s217_s28, %s204_s12, %s729_s30, %s730_s14, %s731_s20  }
  0x20   : > { %p487_p1 = scmp.ge.s32.totalorder %s727_s25, 1  ;;  %p224_p2 = scmp.lt.s32.totalorder %s727_s25, 5 }
  0x22   : > { %p225_p4 = pnand %p487_p1, %p224_p2 }
  0x23   : > { %s856_s15 = sand.u32 (!%p225_p4), 1, %s703_s19  }
  0x24   : > { %228 = sbr.rel (%p225_p4) target bundleno = 355 (0x163), region = 40  ;;  %s488_s29 = sshll.u32 (!%p225_p4), %s856_s15, 4 }
  0x25   : > { %s231_s7 = scalar_lea.sflag (!%p225_p4), [#allocation3], %s856_s15  ;;  %s234_s16 = scalar_lea.vmem (!%p225_p4), [#allocation2], %s488_s29 }
  0x29   : > { %690 = dma.done.wait (%p827_p8), %s231_s7, 256  }
  0x2a   : > { %692 = vsyncadd (%p827_p8), %s231_s7, 4294967040  ;;  %v732_v0 = vmov 0   ;;  %v263_v1 = vld [vmem:[%s234_s16] sm:$0xff]  ;;  %v866_v2 = vld [vmem:[%s234_s16 + $0x8] sm:$0xff]  ;;  %vm273_vm0 = vcmask 130048   ;;  %vm315_vm1 = vcmask 1040384  }
  0x2b   : > { %589 = vset.pattern.permute.xlu0 %v732_v0  ;;  %590 = vset.pattern.permute.xlu1 %v732_v0  ;;  %v265_v3 = vpack.c.bf16 %v866_v2, %v263_v1  ;;  %v267_v4 = vld [vmem:[%s933_s2] sm:$0x3]  ;;  %v295_v7 = vld [vmem:[%s935_s4 + $0x8] sm:$0xff]  ;;  %vm311_vm2 = vcmask 15360   ;;  %s499_s10 = sshll.u32 %s715_s22, 2  ;;  %s376_s12 = scalar_lea.sflag [#allocation4], %s856_s15 }
  0x2c   : > { %270 = vperm.xlu0 %589, %v267_v4   ;;  %v266_v5 = vld [vmem:[%s932_s1] sm:$0x1]  ;;  %303 = vperm.xlu1 %590, %v295_v7   ;;  %s386_s11 = sadd.s32 %s711_s21, %s499_s10  ;;  %s261_s21 = scalar_lea.vmem [#allocation5], %s488_s29 }
  0x2d   : > { %284 = vmatpush.bf16.msra.mxu0 %v265_v3  ;;  %v294_v6 = vld [vmem:[%s935_s4] sm:$0xff]  ;;  %s500_s30 = sshll.u32 %s386_s11, 3  ;;  %s389_s20 = sshll.u32 %s261_s21, 4  ;;  %s390_s20 = int_to_ptr.vmem [resolvable:$true] %s389_s20 }
  0x2e   : > { %v503_v14 = vld [vmem:[%s934_s3] sm:$0xff]  ;;  %s388_s16 = scalar_lea.hbm %s936_s5, %s500_s30  ;;  %s649_s17 = scalar_lea.hbm %s936_s5, 64 }
  0x2f   : > { %s391_s28 = sshll.u32 %s388_s16, 4  ;;  %s392_s28 = int_to_ptr.hbm [resolvable:$true] %s391_s28 }
  0x30   : > { %490 = vmatmul.msk.bf16.vlgmr.msra.gmra.mxu0 %vm273_vm0, %v266_v5  ;;  %s643_s13 = sshra.s32 %s392_s28, 4  ;;  %s644_s13 = int_to_ptr.hbm [resolvable:$true] %s643_s13 }
  0x31   : > { %s645_s29 = scalar_lea.hbm %s644_s13, 16  ;;  %p650_p7 = scmp.lt.s32.totalorder %s644_s13, %s936_s5 }
  0x32   : > { %p646_p3 = scmp.ne.s32.totalorder %s644_s13, %s645_s29  ;;  %p651_p8 = scmp.lt.s32.totalorder %s649_s17, %s645_s29 }
  0x34   : > { %298 = vperm.xlu0 %589, %v294_v6   ;;  %p647_p5 = pnand %p646_p3, %p831_p9  ;;  %p652_p10 = por %p651_p8, %p650_p7 }
  0x36   : > { %p648_p6 = pneg %p647_p5 }
  0x38   : > { %p653_p11 = pnand %p652_p10, %p648_p6 }
  0x9e   : > { %v271_v8 = vpop.permute.xlu0 %270  ;;  %v304_v20 = vpop.permute.xlu1 %303 }
  0xa6   : > { %v299_v16 = vpop.permute.xlu0 %298 }
  0xad   : > { %v286_v9 = vpop.f32.mrf.mxu0 }
  0xae   : > { %v287_v10 = vadd.f32 %v286_v9, %v271_v8 }
  0xb0   : > { %v290_v11 = vmax.f32 %v287_v10, 0.0 }
  0xb2   : > { %v293_v12 = vpack.c.bf16 %v290_v11, %v290_v11 }
  0xb4   : > { %v317_v13 = vsel %vm315_vm1, %v293_v12, 0 }
  0xb5   : > { %v288_v15 = vpop.f32.mrf.mxu0  ;;  %326 = vmatpush.bf16.msra.mxu1 %v317_v13 }
  0xb8   : > { %495 = vmatmul.msk.bf16.vlgmr.msra.gmra.mxu1 %vm311_vm2, %v503_v14 }
 0x135   : > { %v328_v17 = vpop.f32.mrf.mxu1 }
 0x136   : > { %v329_v18 = vadd.f32 %v328_v17, %v299_v16 }
 0x138   : > { %v496_v19 = vmul.f32 -1.442695, %v329_v18 }
 0x13a   : > { %591 = vpow2.f32 %v496_v19 }
 0x13d   : > { %v330_v21 = vpop.f32.mrf.mxu1 }
 0x13e   : > { %v331_v22 = vadd.f32 %v330_v21, %v304_v20 }
 0x140   : > { %v592_v23 = vpop.eup %591  ;;  %v497_v24 = vmul.f32 -1.442695, %v331_v22 }
 0x141   : > { %v339_v25 = vadd.f32 1.0, %v592_v23 }
 0x142   : > { %593 = vpow2.f32 %v497_v24 }
 0x143   : > { %595 = vrcp.f32 %v339_v25  ;;  %v352_v31 = vand.u32 2147483648, %v339_v25  ;;  %v350_v33 = vand.u32 2147483647, %v339_v25  ;;  %vm346_vm4 = vweird.f32 %v339_v25 }
 0x145   : > { %v353_v36 = vor.u32 1.1754944e-38, %v352_v31  ;;  %vm351_vm6 = vcmp.eq.f32.partialorder %v350_v33, 8.507059e+37 }
 0x148   : > { %v594_v26 = vpop.eup %593 }
 0x149   : > { %v596_v27 = vpop.eup %595  ;;  %v340_v28 = vadd.f32 1.0, %v594_v26 }
 0x14a   : > { %v342_v29 = vmul.f32 %v596_v27, %v339_v25  ;;  %vm347_vm3 = vweird.f32 %v596_v27 }
 0x14b   : > { %597 = vrcp.f32 %v340_v28  ;;  %vm348_vm5 = vmor %vm346_vm4, %vm347_vm3  ;;  %v367_v42 = vand.u32 2147483648, %v340_v28  ;;  %v365_v44 = vand.u32 2147483647, %v340_v28  ;;  %vm361_vm8 = vweird.f32 %v340_v28 }
 0x14c   : > { %v343_v30 = vsub.f32 1.0, %v342_v29 }
 0x14d   : > { %v368_v46 = vor.u32 1.1754944e-38, %v367_v42  ;;  %vm366_vm10 = vcmp.eq.f32.partialorder %v365_v44, 8.507059e+37 }
 0x14e   : > { %v344_v32 = vmul.f32 %v596_v27, %v343_v30 }
 0x150   : > { %v345_v34 = vadd.f32 %v596_v27, %v344_v32 }
 0x151   : > { %v598_v35 = vpop.eup %597 }
 0x152   : > { %v349_v37 = vsel %vm348_vm5, %v596_v27, %v345_v34  ;;  %v357_v38 = vmul.f32 %v598_v35, %v340_v28  ;;  %vm362_vm7 = vweird.f32 %v598_v35 }
 0x153   : > { %v354_v39 = vsel %vm351_vm6, %v353_v36, %v349_v37  ;;  %vm363_vm9 = vmor %vm361_vm8, %vm362_vm7 }
 0x154   : > { %v371_v40 = vmul.f32 %v354_v39, %v263_v1  ;;  %v358_v41 = vsub.f32 1.0, %v357_v38 }
 0x156   : > { %v359_v43 = vmul.f32 %v598_v35, %v358_v41  ;;  %373 = vst [vmem:[%s261_s21] sm:$0xff] %v371_v40 }
 0x158   : > { %v360_v45 = vadd.f32 %v598_v35, %v359_v43 }
 0x15a   : > { %v364_v47 = vsel %vm363_vm9, %v598_v35, %v360_v45 }
 0x15b   : > { %v369_v48 = vsel %vm366_vm10, %v368_v46, %v364_v47 }
 0x15c   : > { %v372_v49 = vmul.f32 %v369_v48, %v866_v2 }
 0x15e   : > { %374 = vst [vmem:[%s261_s21 + $0x8] sm:$0xff] %v372_v49 }
 0x15f   : > { %656 = shalt.err (!%p653_p11)
}
 0x160   : > { %s733_s15 = smov 128   ;;  %s734_s6 = smov 256  }
 0x161   : > { %s735_s10 = smov 8  }
 0x162   : > { %506 = dma.vmem_to_hbm [thread:$0]  (%p831_p9), %s390_s20, 256, %s392_s28, %s376_s12, %s733_s15, %s734_s6, %s735_s10  }
 0x163 PF: > { %p517_p13 = scmp.ge.s32.totalorder %s727_s25, 2  ;;  %s406_s30 = sand.u32 1, %s699_s18  }
 0x164   : > { %s407_s22 = scalar_lea.sflag [#allocation4], %s406_s30 }
 0x165   : > { %p513_p0 = pnand %p517_p13, %p837_p12 }
 0x167   : > { %p514_p1 = pneg %p513_p0 }
 0x169   : > { %694 = dma.done.wait (%p514_p1), %s407_s22, 256  }
 0x16a   : > { %696 = vsyncadd (%p514_p1), %s407_s22, 4294967040  ;;  %s21_s25 = sadd.s32 1, %s727_s25   ;;  %s951_s7 = sld [smem:[#allocation8_spill]] }
 0x16b   : > { %p18_p2 = scmp.ge.s32.totalorder %s21_s25, 6   ;;  %s952_s20 = sld [smem:[#allocation12_spill]] }
 0x16c   : > { %s953_s9 = sld [smem:[#allocation9_spill]]  ;;  %s955_s18 = smov %s703_s19 }
 0x16d   : > { %s954_s16 = sld [smem:[#allocation10_spill]]  ;;  %s957_s21 = smov %s719_s23 }
 0x16e   : > { %s958_s22 = smov %s723_s24 }
 0x16f   :  { %20 = sbr.rel (!%p18_p2) target bundleno = 7 (0x7), region = 85 }
 0x170   : > { %s956_s19 = smov %s951_s7 }
 0x172   : > { %s959_s23 = smov %s953_s9 }
 0x173   : > { %s960_s24 = smov %s954_s16 }
 0x174   :  { %413 = vsyncpa [#allocation3], 1 }
 0x175   :  { %415 = vsyncpa [#allocation3 + $0x1], 1 }
 0x176   :  { %416 = vsyncpa [#allocation4], 1 }
 0x177   :  { %418 = vsyncpa [#allocation4 + $0x1], 1 }

</bundles_post_ra>
